<compile_context>
chip_gen: v5e
topology: v5e:2x2
jax: 0.10.0
libtpu: 0.0.40
codegen_flags: <defaults>
</compile_context>

<pallas_src>
import jax
import jax.numpy as jnp
import numpy as np
from jax.experimental import pallas as pl
from jax.experimental.pallas import tpu as pltpu


# ---------------------------------------------------------------------------
# Kernel: batched SE (global avg pool -> FC -> ReLU -> FC -> sigmoid -> scale)
# ---------------------------------------------------------------------------
def _se_kernel(x_ref, w1t_ref, w2t_ref, o_ref):
    # x_ref  : (Nb, C, HW)   Nb samples, channels on sublanes, spatial on lanes
    # w1t_ref: (C, hidden)   fc1.weight.T (bias-free)
    # w2t_ref: (hidden, C)   fc2.weight.T (bias-free)
    # o_ref  : (Nb, C, HW)
    x = x_ref[...]
    xf = x.astype(jnp.float32)                                   # f32 compute path

    # Global average pool over the spatial (lane) axis, f32 accumulation.
    pooled = jnp.mean(xf, axis=2)                                # (Nb, C)

    # Batched squeeze/excite MLP: one matmul per block, not per sample.
    z = jnp.maximum(
        jnp.dot(pooled, w1t_ref[...], preferred_element_type=jnp.float32),
        0.0)                                                     # (Nb, hidden)
    gate = jax.nn.sigmoid(
        jnp.dot(z, w2t_ref[...], preferred_element_type=jnp.float32))  # (Nb, C)

    # Channel-wise scale; (Nb, C, 1) gate broadcasts along the lane axis.
    o_ref[...] = (xf * gate[:, :, None]).astype(o_ref.dtype)


# ---------------------------------------------------------------------------
# Block-size heuristic (HBM-bandwidth-bound kernel)
# ---------------------------------------------------------------------------
def _pick_block_batch(N, C, HW, itemsize):
    bytes_per_sample = C * HW * itemsize
    # Target ~2 MiB per streaming slab (per reference data, >=512-wide tiles
    # reach ~85% of HBM roofline; tiny per-sample blocks sit at ~29%).
    target_block_bytes = 2 << 20
    nb = max(1, min(N, target_block_bytes // max(1, bytes_per_sample)))
    # Cap so double-buffered in+out (4 x block) stays far below v7x's 64 MiB.
    max_block_bytes = 10 << 20
    nb = max(1, min(nb, max_block_bytes // max(1, bytes_per_sample)))
    # Keep >=2 grid steps so the "parallel" batch axis can shard across
    # v7x's two TensorCores instead of leaving one idle.
    if nb >= N and N > 1:
        nb = pl.cdiv(N, 2)
    return nb


# ---------------------------------------------------------------------------
# Wrapper (NCHW in / NCHW out, like the PyTorch module)
# ---------------------------------------------------------------------------
@jax.jit
def se_forward(x_nchw, w1, w2):
    N, C, H, W = x_nchw.shape
    HW = H * W
    hidden = w1.shape[0]
    itemsize = x_nchw.dtype.itemsize

    # Free collapse of (H, W) onto the lane axis; NCHW ordering preserved.
    x2 = x_nchw.reshape(N, C, HW)
    # TODO(synk): for real SE stages where H*W is not a multiple of 128
    # (7x7, 14x14), fold/pad so the lane axis is 128-dense to avoid vst.msk.

    nb = _pick_block_batch(N, C, HW, itemsize)
    n_blocks = pl.cdiv(N, nb)

    # Pre-transpose the tiny FC weights once (trace-time, effectively free);
    # they stay VMEM-resident via the constant index_map.
    w1t = w1.T                                       # (C, hidden)
    w2t = w2.T                                       # (hidden, C)

    # Explicit VMEM budget: double-buffered input + output blocks + weights,
    # plus headroom; capped below v7x's 64 MiB physical VMEM.
    block_bytes = nb * C * HW * itemsize
    weight_bytes = 2 * C * hidden * w1.dtype.itemsize
    vmem_limit = int(min(max(4 * block_bytes + 4 * weight_bytes + (4 << 20),
                             16 << 20),
                         48 << 20))

    cost = pl.CostEstimate(
        flops=3 * N * C * HW + 4 * N * C * hidden,
        transcendentals=N * C,
        bytes_accessed=2 * N * C * HW * itemsize + weight_bytes,
    )

    out = pl.pallas_call(
        _se_kernel,
        out_shape=jax.ShapeDtypeStruct((N, C, HW), x2.dtype),
        grid=(n_blocks,),
        in_specs=[
            pl.BlockSpec((nb, C, HW), lambda n: (n, 0, 0)),
            pl.BlockSpec((C, hidden), lambda n: (0, 0)),
            pl.BlockSpec((hidden, C), lambda n: (0, 0)),
        ],
        out_specs=pl.BlockSpec((nb, C, HW), lambda n: (n, 0, 0)),
        compiler_params=pltpu.CompilerParams(
            dimension_semantics=("parallel",),
            vmem_limit_bytes=vmem_limit),
        cost_estimate=cost,
    )(x2, w1t, w2t)

    return out.reshape(N, C, H, W)


# ---------------------------------------------------------------------------
# Pure-JAX reference (for correctness check only)
# ---------------------------------------------------------------------------
def _reference(x_nchw, w1, w2):
    pooled = jnp.mean(x_nchw.astype(jnp.float32), axis=(2, 3))   # (N, C)
    z = jnp.maximum(pooled @ w1.T, 0.0)                          # (N, hidden)
    gate = jax.nn.sigmoid(z @ w2.T)                              # (N, C)
    return x_nchw.astype(jnp.float32) * gate[:, :, None, None]


if __name__ == "__main__":
    # Small shapes consistent with the module: batch=4, channels=64,
    # spatial=16x16, reduction=16 (module default) -> hidden=4.
    N, C, H, W = 4, 64, 16, 16
    REDUCTION = 16
    hidden = C // REDUCTION

    key = jax.random.PRNGKey(0)
    kx, k1, k2 = jax.random.split(key, 3)
    x = jax.random.normal(kx, (N, C, H, W), jnp.float32)
    # PyTorch nn.Linear(bias=False) layouts: fc1 (hidden, C), fc2 (C, hidden)
    w1 = 0.2 * jax.random.normal(k1, (hidden, C), jnp.float32)
    w2 = 0.2 * jax.random.normal(k2, (C, hidden), jnp.float32)

    # f32 path
    out = jax.block_until_ready(se_forward(x, w1, w2))
    ref = _reference(x, w1, w2)
    np.testing.assert_allclose(np.asarray(out), np.asarray(ref),
                               rtol=1e-5, atol=1e-5)
    assert out.shape == (N, C, H, W)

    # bf16 I/O path (f32 accumulation inside the kernel, bf16 store)
    xb = x.astype(jnp.bfloat16)
    outb = jax.block_until_ready(se_forward(xb, w1, w2))
    refb = _reference(xb, w1, w2)
    np.testing.assert_allclose(np.asarray(outb, dtype=np.float32),
                               np.asarray(refb), rtol=5e-2, atol=5e-2)
    assert outb.shape == (N, C, H, W) and outb.dtype == jnp.bfloat16

    print("KERNEL_OK")
</pallas_src>

<mosaic_0001>
module attributes {stable_mosaic.version = 11 : i64} {
  func.func @_se_kernel(%arg0: i32, %arg1: memref<2x64x256xf32, #tpu.memory_space<vmem>>, %arg2: memref<64x4xf32, #tpu.memory_space<vmem>>, %arg3: memref<4x64xf32, #tpu.memory_space<vmem>>, %arg4: memref<2x64x256xf32, #tpu.memory_space<vmem>>) attributes {dimension_semantics = [#tpu.dimension_semantics<parallel>], iteration_bounds = array<i64: 2>, scalar_prefetch = 0 : i64, scratch_operands = 0 : i64, tpu.core_type = #tpu.core_type<tc>, window_params = [{transform_indices = @transform_0, window_bounds = array<i64: 2, 64, 256>}, {pipeline_mode = #tpu.pipeline_mode<synchronous>, transform_indices = @transform_1, window_bounds = array<i64: 64, 4>}, {pipeline_mode = #tpu.pipeline_mode<synchronous>, transform_indices = @transform_2, window_bounds = array<i64: 4, 64>}, {transform_indices = @transform_3, window_bounds = array<i64: 2, 64, 256>}]} {
    %c0 = arith.constant 0 : index
    %c0_0 = arith.constant 0 : index
    %c0_1 = arith.constant 0 : index
    %0 = vector.load %arg1[%c0, %c0_0, %c0_1] : memref<2x64x256xf32, #tpu.memory_space<vmem>>, vector<2x64x256xf32>
    %cst = arith.constant dense<0.000000e+00> : vector<2x64xf32>
    %1 = vector.multi_reduction <add>, %0, %cst [2] : vector<2x64x256xf32> to vector<2x64xf32>
    %cst_2 = arith.constant 2.560000e+02 : f32
    %2 = vector.broadcast %cst_2 : f32 to vector<2x64xf32>
    %3 = arith.divf %1, %2 : vector<2x64xf32>
    %c0_3 = arith.constant 0 : index
    %c0_4 = arith.constant 0 : index
    %4 = vector.load %arg2[%c0_3, %c0_4] : memref<64x4xf32, #tpu.memory_space<vmem>>, vector<64x4xf32>
    %cst_5 = arith.constant dense<0.000000e+00> : vector<2x4xf32>
    %5 = tpu.matmul %3, %4, %cst_5 {dimension_numbers = #tpu.dot_dimension_numbers<[1], [0], [0], [1], [0, 0, 1, 1], [], []>} : vector<2x64xf32>, vector<64x4xf32>, vector<2x4xf32> -> vector<2x4xf32>
    %cst_6 = arith.constant 0.000000e+00 : f32
    %6 = vector.broadcast %cst_6 : f32 to vector<2x4xf32>
    %7 = arith.maximumf %5, %6 : vector<2x4xf32>
    %c0_7 = arith.constant 0 : index
    %c0_8 = arith.constant 0 : index
    %8 = vector.load %arg3[%c0_7, %c0_8] : memref<4x64xf32, #tpu.memory_space<vmem>>, vector<4x64xf32>
    %cst_9 = arith.constant dense<0.000000e+00> : vector<2x64xf32>
    %9 = tpu.matmul %7, %8, %cst_9 {dimension_numbers = #tpu.dot_dimension_numbers<[1], [0], [0], [1], [0, 0, 1, 1], [], []>} : vector<2x4xf32>, vector<4x64xf32>, vector<2x64xf32> -> vector<2x64xf32>
    %10 = arith.negf %9 : vector<2x64xf32>
    %11 = math.exp %10 : vector<2x64xf32>
    %cst_10 = arith.constant 1.000000e+00 : f32
    %12 = vector.broadcast %cst_10 : f32 to vector<2x64xf32>
    %13 = arith.addf %12, %11 : vector<2x64xf32>
    %14 = arith.divf %12, %13 : vector<2x64xf32>
    %15 = vector.shape_cast %14 : vector<2x64xf32> to vector<2x64x1xf32>
    %16 = vector.broadcast %15 : vector<2x64x1xf32> to vector<2x64x256xf32>
    %17 = arith.mulf %0, %16 : vector<2x64x256xf32>
    %c0_11 = arith.constant 0 : index
    %c0_12 = arith.constant 0 : index
    %c0_13 = arith.constant 0 : index
    %18 = vector.load %arg4[%c0_11, %c0_12, %c0_13] : memref<2x64x256xf32, #tpu.memory_space<vmem>>, vector<2x64x256xf32>
    tpu.vector_store %arg4[%c0_11, %c0_12, %c0_13], %17 {strides = array<i32>} : memref<2x64x256xf32, #tpu.memory_space<vmem>>, vector<2x64x256xf32>,
    return
  }
  func.func @transform_0(%arg0: i32) -> (i32, i32, i32) {
    %c0_i32 = arith.constant 0 : i32
    %c0_i32_0 = arith.constant 0 : i32
    %c0_i32_1 = arith.constant 0 : i32
    return %arg0, %c0_i32, %c0_i32_0 : i32, i32, i32
  }
  func.func @transform_1(%arg0: i32) -> (i32, i32) {
    %c0_i32 = arith.constant 0 : i32
    %c0_i32_0 = arith.constant 0 : i32
    %c0_i32_1 = arith.constant 0 : i32
    return %c0_i32, %c0_i32_0 : i32, i32
  }
  func.func @transform_2(%arg0: i32) -> (i32, i32) {
    %c0_i32 = arith.constant 0 : i32
    %c0_i32_0 = arith.constant 0 : i32
    %c0_i32_1 = arith.constant 0 : i32
    return %c0_i32, %c0_i32_0 : i32, i32
  }
  func.func @transform_3(%arg0: i32) -> (i32, i32, i32) {
    %c0_i32 = arith.constant 0 : i32
    %c0_i32_0 = arith.constant 0 : i32
    %c0_i32_1 = arith.constant 0 : i32
    return %arg0, %c0_i32, %c0_i32_0 : i32, i32, i32
  }
}

</mosaic_0001>

<bundles_post_ra>
// kernel: se_forward.1
= control target key start
LH: loop header
LB: loop body
LE: loop exit
PB: predicated region body
PF: predicated region fallthrough
CT: control target
= control target key end

     0   :  { %s726_s12 = smov 0   ;;  %s983_s0 = inlined_call_operand.vmem [shape: f32[4,64,256], index: 0, kind: input, shape index: {}]   ;;  %s984_s1 = inlined_call_operand.vmem [shape: f32[64,4], index: 1, kind: input, shape index: {}]   ;;  %s985_s2 = inlined_call_operand.vmem [shape: f32[4,64], index: 2, kind: input, shape index: {}]   ;;  %s986_s3 = inlined_call_operand.vmem [shape: f32[4,64,256], index: 3, kind: output, shape index: {}]  }
   0x1 LB: > { %s646_s13 = sadd.s32 4294967295, %s703_s12   ;;  %p650_p0 = scmp.ge.s32.totalorder %s703_s12, 1  ;;  %s703_s12 = sphi %s726_s12, %s13_s12  }
   0x2   : > { %p139_p1 = scmp.lt.s32.totalorder %s703_s12, 3 }
   0x4   : > { %p140_p2 = pnand %p650_p0, %p139_p1 }
   0x6   : > { %143 = sbr.rel (%p140_p2) target bundleno = 667 (0x29b), region = 32 }
   0xb   : > { %s651_s14 = sshll.u32 %s646_s13, 1  ;;  %v289_v48 = vld [vmem:[%s984_s1 + $0x38] sm:$0xff]  ;;  %v705_v49 = vmov 256.0   ;;  %v288_v53 = vld [vmem:[%s984_s1 + $0x30] sm:$0xff]  ;;  %v287_v54 = vld [vmem:[%s984_s1 + $0x28] sm:$0xff]  ;;  %vm311_vm1 = vcmask 130112  }
   0xc   : > { %p166_p3 = scmp.lt.s32.totalorder %s651_s14, 3  ;;  %691 = vrcp.f32 %v705_v49  ;;  %365 = vmatpush.msra.mxu0 %v289_v48  ;;  %v286_v55 = vld [vmem:[%s984_s1 + $0x20] sm:$0xff]  ;;  %v285_v57 = vld [vmem:[%s984_s1 + $0x18] sm:$0xff]  ;;  %v284_v62 = vld [vmem:[%s984_s1 + $0x10] sm:$0xff]  ;;  %vm315_vm2 = vcmask 195712   ;;  %vm319_vm3 = vcmask 261312  }
   0xd   : > { %v283_v63 = vld [vmem:[%s984_s1 + $0x8] sm:$0xff]  ;;  %vm323_vm4 = vcmask 326912   ;;  %vm327_vm5 = vcmask 392512   ;;  %vm331_vm6 = vcmask 458112   ;;  %vm335_vm7 = vcmask 523712  }
   0xe   : > { %s999_s14 = smov (!%p166_p3, %s651_s14), 3  ;;  %366 = vmatpush.msra.mxu0 %v288_v53  ;;  %vm352_vm8 = vcmask 1041409   ;;  %vm354_vm9 = vcmask 523264   ;;  %vm383_vm10 = vcmask 1043456   ;;  %vm379_vm11 = vcmask 31744  }
   0xf   : > { %s663_s15 = sshll.u32 %s999_s14, 7 }
  0x10   : > { %s742_s18 = scalar_lea.vmem %s983_s0, %s663_s15  ;;  %367 = vmatpush.msra.mxu0 %v287_v54  ;;  %s914_s13 = scalar_lea.vmem %s986_s3, %s663_s15 }
  0x11   : > { %v745_v0 = vld [vmem:[%s742_s18 + $0x80] sm:$0xff]  ;;  %v748_v1 = vld [vmem:[%s742_s18 + $0x88] sm:$0xff]  ;;  %v769_v9 = vld [vmem:[%s742_s18 + $0x90] sm:$0xff] }
  0x12   : > { %v751_v2 = vld [vmem:[%s742_s18] sm:$0xff]  ;;  %v235_v3 = vadd.f32 %v748_v1, %v745_v0  ;;  %v756_v4 = vld [vmem:[%s742_s18 + $0x8] sm:$0xff]  ;;  %v772_v10 = vld [vmem:[%s742_s18 + $0x98] sm:$0xff]  ;;  %v692_v56 = vpop.eup %691  ;;  %368 = vmatpush.msra.mxu0 %v286_v55 }
  0x13   : > { %v759_v5 = vld [vmem:[%s742_s18 + $0x20] sm:$0xff]  ;;  %v762_v6 = vld [vmem:[%s742_s18 + $0x28] sm:$0xff]  ;;  %v211_v7 = vadd.f32 %v756_v4, %v751_v2  ;;  %v775_v11 = vld [vmem:[%s742_s18 + $0x10] sm:$0xff]  ;;  %v238_v15 = vadd.f32 %v772_v10, %v769_v9  ;;  %v260_v59 = vmul.f32 256.0, %v692_v56  ;;  %vm264_vm0 = vweird.f32 %v692_v56 }
  0x14   : > { %v217_v8 = vadd.f32 %v762_v6, %v759_v5  ;;  %236 = vadd.xlane.f32.xlu1 %v235_v3  ;;  %v778_v12 = vld [vmem:[%s742_s18 + $0x18] sm:$0xff]  ;;  %v781_v13 = vld [vmem:[%s742_s18 + $0xa0] sm:$0xff]  ;;  %v784_v14 = vld [vmem:[%s742_s18 + $0xa8] sm:$0xff]  ;;  %369 = vmatpush.msra.mxu0 %v285_v57 }
  0x15   : > { %212 = vadd.xlane.f32.xlu0 %v211_v7  ;;  %v214_v16 = vadd.f32 %v778_v12, %v775_v11  ;;  %v241_v17 = vadd.f32 %v784_v14, %v781_v13  ;;  %v793_v18 = vld [vmem:[%s742_s18 + $0xb0] sm:$0xff]  ;;  %v796_v19 = vld [vmem:[%s742_s18 + $0xb8] sm:$0xff]  ;;  %v805_v22 = vld [vmem:[%s742_s18 + $0x40] sm:$0xff]  ;;  %v261_v7 = vsub.f32 1.0, %v260_v59 }
  0x16   : > { %218 = vadd.xlane.f32.xlu2 %v217_v8  ;;  %v799_v20 = vld [vmem:[%s742_s18 + $0x30] sm:$0xff]  ;;  %v802_v21 = vld [vmem:[%s742_s18 + $0x38] sm:$0xff]  ;;  %v808_v23 = vld [vmem:[%s742_s18 + $0x48] sm:$0xff]  ;;  %v244_v24 = vadd.f32 %v796_v19, %v793_v18  ;;  %370 = vmatpush.msra.mxu0 %v284_v62 }
  0x17   : > { %v220_v25 = vadd.f32 %v802_v21, %v799_v20  ;;  %v223_v26 = vadd.f32 %v808_v23, %v805_v22  ;;  %v817_v27 = vld [vmem:[%s742_s18 + $0x50] sm:$0xff]  ;;  %v820_v28 = vld [vmem:[%s742_s18 + $0x58] sm:$0xff]  ;;  %v823_v29 = vld [vmem:[%s742_s18 + $0xc0] sm:$0xff] }
  0x18   : > { %v826_v30 = vld [vmem:[%s742_s18 + $0xc8] sm:$0xff]  ;;  %v829_v31 = vld [vmem:[%s742_s18 + $0xd0] sm:$0xff]  ;;  %v832_v32 = vld [vmem:[%s742_s18 + $0xd8] sm:$0xff]  ;;  %v226_v33 = vadd.f32 %v820_v28, %v817_v27  ;;  %371 = vmatpush.msra.mxu0 %v283_v63 }
  0x19   : > { %991 = vst [vmem:[#allocation2_spill] sm:$0xff] %v829_v31  ;;  %v247_v34 = vadd.f32 %v826_v30, %v823_v29  ;;  %v250_v35 = vadd.f32 %v832_v32, %v829_v31  ;;  %v841_v36 = vld [vmem:[%s742_s18 + $0xe0] sm:$0xff]  ;;  %v844_v37 = vld [vmem:[%s742_s18 + $0xe8] sm:$0xff]  ;;  %v853_v40 = vld [vmem:[%s742_s18 + $0x70] sm:$0xff] }
  0x1a   : > { %992 = vst [vmem:[#allocation3_spill] sm:$0xff] %v832_v32  ;;  %v847_v38 = vld [vmem:[%s742_s18 + $0x60] sm:$0xff]  ;;  %v850_v39 = vld [vmem:[%s742_s18 + $0x68] sm:$0xff]  ;;  %v856_v41 = vld [vmem:[%s742_s18 + $0x78] sm:$0xff]  ;;  %v253_v42 = vadd.f32 %v844_v37, %v841_v36 }
  0x1b   : > { %v229_v43 = vadd.f32 %v850_v39, %v847_v38  ;;  %v232_v44 = vadd.f32 %v856_v41, %v853_v40  ;;  %v865_v45 = vld [vmem:[%s742_s18 + $0xf0] sm:$0xff]  ;;  %v868_v46 = vld [vmem:[%s742_s18 + $0xf8] sm:$0xff]  ;;  %v282_v3 = vld [vmem:[%s984_s1] sm:$0xff] }
  0x1c   : > { %239 = vadd.xlane.f32.xlu1 %v238_v15  ;;  %993 = vst [vmem:[#allocation4_spill] sm:$0xff] %v868_v46  ;;  %v256_v47 = vadd.f32 %v868_v46, %v865_v45  ;;  %372 = vmatpush.msra.mxu0 %v282_v3  ;;  %v262_v15 = vmul.f32 %v692_v56, %v261_v7 }
  0x1d   : > { %215 = vadd.xlane.f32.xlu0 %v214_v16 }
  0x1e   : > { %242 = vadd.xlane.f32.xlu2 %v241_v17 }
  0x24   : > { %245 = vadd.xlane.f32.xlu1 %v244_v24  ;;  %v987_v24 = vlaneseq }
  0x25   : > { %221 = vadd.xlane.f32.xlu0 %v220_v25  ;;  %v263_v25 = vadd.f32 %v692_v56, %v262_v15 }
  0x26   : > { %224 = vadd.xlane.f32.xlu2 %v223_v26  ;;  %v307_v26 = vand.u32 127, %v987_v24 }
  0x28   : > { %v313_v53 = vadd.s32 4294967280, %v307_v26  ;;  %v317_v57 = vadd.s32 4294967272, %v307_v26 }
  0x2c   : > { %227 = vadd.xlane.f32.xlu1 %v226_v33 }
  0x2d   : > { %248 = vadd.xlane.f32.xlu0 %v247_v34  ;;  %v265_v34 = vsel %vm264_vm0, %v692_v56, %v263_v25  ;;  %v321_v25 = vadd.s32 4294967264, %v307_v26 }
  0x2e   : > { %251 = vadd.xlane.f32.xlu2 %v250_v35 }
  0x34   : > { %254 = vadd.xlane.f32.xlu1 %v253_v42 }
  0x35   : > { %230 = vadd.xlane.f32.xlu0 %v229_v43  ;;  %v309_v43 = vadd.s32 4294967288, %v307_v26 }
  0x36   : > { %233 = vadd.xlane.f32.xlu2 %v232_v44 }
  0x3d   : > { %257 = vadd.xlane.f32.xlu0 %v256_v47 }
  0x87   : > { %v237_v50 = vpop.xlane.xlu1 %236 }
  0x88   : > { %v213_v51 = vpop.xlane.xlu0 %212  ;;  %v274_v47 = vmul.f32 %v265_v34, %v237_v50 }
  0x89   : > { %v219_v52 = vpop.xlane.xlu2 %218  ;;  %v266_v48 = vmul.f32 %v265_v34, %v213_v51 }
  0x8a   : > { %v268_v54 = vmul.f32 %v265_v34, %v219_v52  ;;  %v337_v63 = vperm.slane %v274_v47, %v307_v26 }
  0x8b   : > { %v308_v3 = vperm.slane %v266_v48, %v307_v26 }
  0x8c   : > { %v314_v56 = vperm.slane %v268_v54, %v313_v53 }
  0x8f   : > { %v240_v58 = vpop.xlane.xlu1 %239 }
  0x90   : > { %v216_v60 = vpop.xlane.xlu0 %215  ;;  %v275_v49 = vmul.f32 %v265_v34, %v240_v58  ;;  %v325_v58 = vadd.s32 4294967256, %v307_v26 }
  0x91   : > { %v243_v61 = vpop.xlane.xlu2 %242  ;;  %v267_v44 = vmul.f32 %v265_v34, %v216_v60 }
  0x92   : > { %v276_v62 = vmul.f32 %v265_v34, %v243_v61  ;;  %v338_v7 = vperm.slane %v275_v49, %v309_v43 }
  0x93   : > { %v310_v55 = vperm.slane %v267_v44, %v309_v43 }
  0x94   : > { %v340_v31 = vperm.slane %v276_v62, %v313_v53  ;;  %v339_v47 = vsel %vm311_vm1, %v338_v7, %v337_v63 }
  0x95   : > { %v312_v50 = vsel %vm311_vm1, %v310_v55, %v308_v3 }
  0x96   : > { %v341_v53 = vsel %vm315_vm2, %v340_v31, %v339_v47 }
  0x97   : > { %v246_v8 = vpop.xlane.xlu1 %245 }
  0x98   : > { %v222_v16 = vpop.xlane.xlu0 %221  ;;  %v277_v15 = vmul.f32 %v265_v34, %v246_v8 }
  0x99   : > { %v225_v17 = vpop.xlane.xlu2 %224  ;;  %v269_v59 = vmul.f32 %v265_v34, %v222_v16  ;;  %v329_v16 = vadd.s32 4294967248, %v307_v26 }
  0x9a   : > { %v270_v24 = vmul.f32 %v265_v34, %v225_v17  ;;  %v342_v43 = vperm.slane %v277_v15, %v317_v57  ;;  %v316_v17 = vsel %vm315_vm2, %v314_v56, %v312_v50 }
  0x9b   : > { %v318_v51 = vperm.slane %v269_v59, %v317_v57 }
  0x9c   : > { %v343_v3 = vsel %vm319_vm3, %v342_v43, %v341_v53 }
  0x9d   : > { %v320_v54 = vsel %vm319_vm3, %v318_v51, %v316_v17 }
  0x9f   : > { %v228_v33 = vpop.xlane.xlu1 %227 }
  0xa0   : > { %v249_v35 = vpop.xlane.xlu0 %248  ;;  %v271_v52 = vmul.f32 %v265_v34, %v228_v33  ;;  %v333_v33 = vadd.s32 4294967240, %v307_v26 }
  0xa1   : > { %v252_v42 = vpop.xlane.xlu2 %251  ;;  %v278_v32 = vmul.f32 %v265_v34, %v249_v35  ;;  %v322_v35 = vperm.slane %v270_v24, %v321_v25 }
  0xa2   : > { %v279_v8 = vmul.f32 %v265_v34, %v252_v42  ;;  %v326_v55 = vperm.slane %v271_v52, %v325_v58 }
  0xa3   : > { %v344_v48 = vperm.slane %v278_v32, %v321_v25  ;;  %v324_v42 = vsel %vm323_vm4, %v322_v35, %v320_v54 }
  0xa4   : > { %v346_v63 = vperm.slane %v279_v8, %v325_v58  ;;  %v328_v7 = vsel %vm327_vm5, %v326_v55, %v324_v42  ;;  %v378_v58 = vld [vmem:[%s985_s2] sm:$0xf] }
  0xa5   : > { %v345_v57 = vsel %vm323_vm4, %v344_v48, %v343_v3  ;;  %658 = vmatpush.msk.msra.mxu1 %vm383_vm10, %v378_v58 }
  0xa6   : > { %v347_v26 = vsel %vm327_vm5, %v346_v63, %v345_v57 }
  0xa7   : > { %v255_v44 = vpop.xlane.xlu1 %254 }
  0xa8   : > { %v231_v60 = vpop.xlane.xlu0 %230  ;;  %v280_v49 = vmul.f32 %v265_v34, %v255_v44  ;;  %v994_v44 = vlaneseq }
  0xa9   : > { %v272_v46 = vmul.f32 %v265_v34, %v231_v60  ;;  %v234_v61 = vpop.xlane.xlu2 %233 }
  0xaa   : > { %v273_v59 = vmul.f32 %v265_v34, %v234_v61  ;;  %v348_v24 = vperm.slane %v280_v49, %v329_v16 }
  0xab   : > { %v330_v62 = vperm.slane %v272_v46, %v329_v16  ;;  %v428_v16 = vshrl.u32 %v994_v44, 7 }
  0xac   : > { %v334_v15 = vperm.slane %v273_v59, %v333_v33  ;;  %v349_v31 = vsel %vm331_vm6, %v348_v24, %v347_v26 }
  0xad   : > { %v332_v25 = vsel %vm331_vm6, %v330_v62, %v328_v7  ;;  %674 = vset.pattern.permute.xlu1 %v428_v16  ;;  %v441_v61 = vadd.s32 16, %v428_v16  ;;  %v435_v47 = vadd.s32 8, %v428_v16  ;;  %v447_v57 = vadd.s32 24, %v428_v16 }
  0xae   : > { %v336_v46 = vsel %vm335_vm7, %v334_v15, %v332_v25  ;;  %v453_v24 = vadd.s32 32, %v428_v16  ;;  %v465_v7 = vadd.s32 48, %v428_v16  ;;  %v459_v15 = vadd.s32 40, %v428_v16 }
  0xaf   : > { %676 = vset.pattern.permute.xlu0 %v441_v61  ;;  %675 = vset.pattern.permute.xlu2 %v435_v47 }
  0xb0   : > { %v258_v32 = vpop.xlane.xlu0 %257 }
  0xb1   : > { %v281_v56 = vmul.f32 %v265_v34, %v258_v32 }
  0xb3   : > { %v350_v60 = vperm.slane %v281_v56, %v333_v33  ;;  %v471_v56 = vadd.s32 56, %v428_v16 }
  0xb5   : > { %v351_v50 = vsel %vm335_vm7, %v350_v60, %v349_v31 }
  0xb6   : > { %v353_v51 = vsel %vm352_vm8, %v351_v50, %v336_v46 }
  0xb7   : > { %657 = vmatmul.msk.f32.vlgmr.msra.gmra.mxu0 %vm354_vm9, %v353_v51 }
 0x134   : > { %v374_v52 = vpop.f32.mrf.mxu0 }
 0x135   : > { %v377_v34 = vmax.f32 %v374_v52, 0.0 }
 0x137   : > { %659 = vmatmul.msk.f32.vlgmr.msra.gmra.mxu1 %vm379_vm11, %v377_v34 }
 0x1b4   : > { %v404_v43 = vpop.f32.mrf.mxu1 }
 0x1b5   : > { %v660_v8 = vmul.f32 -1.442695, %v404_v43 }
 0x1b7   : > { %693 = vpow2.f32 %v660_v8 }
 0x1bd   : > { %v694_v17 = vpop.eup %693 }
 0x1be   : > { %v410_v35 = vadd.f32 1.0, %v694_v17 }
 0x1c0   : > { %695 = vrcp.f32 %v410_v35  ;;  %v422_v55 = vand.u32 2147483648, %v410_v35  ;;  %v420_v59 = vand.u32 2147483647, %v410_v35  ;;  %vm416_vm13 = vweird.f32 %v410_v35 }
 0x1c2   : > { %v423_v62 = vor.u32 1.1754944e-38, %v422_v55  ;;  %vm421_vm15 = vcmp.eq.f32.partialorder %v420_v59, 8.507059e+37  ;;  %v997_v59 = vld [vmem:[#allocation3_spill] sm:$0xff] }
 0x1c6   : > { %v696_v48 = vpop.eup %695 }
 0x1c7   : > { %v412_v49 = vmul.f32 %v696_v48, %v410_v35  ;;  %vm417_vm12 = vweird.f32 %v696_v48 }
 0x1c8   : > { %vm418_vm14 = vmor %vm416_vm13, %vm417_vm12 }
 0x1c9   : > { %v413_v54 = vsub.f32 1.0, %v412_v49 }
 0x1cb   : > { %v414_v33 = vmul.f32 %v696_v48, %v413_v54  ;;  %v995_v54 = vld [vmem:[#allocation4_spill] sm:$0xff] }
 0x1cd   : > { %v415_v53 = vadd.f32 %v696_v48, %v414_v33 }
 0x1cf   : > { %v419_v3 = vsel %vm418_vm14, %v696_v48, %v415_v53 }
 0x1d0   : > { %v424_v63 = vsel %vm421_vm15, %v423_v62, %v419_v3 }
 0x1d1   : > { %v426_v42 = vperm.slane %v424_v63, 0  ;;  %v475_v32 = vperm.slane %v424_v63, 1 }
 0x1d3   : > { %443 = vperm.xlu0 %676, %v426_v42   ;;  %437 = vperm.xlu2 %675, %v426_v42  }
 0x1d4   : > { %431 = vperm.xlu1 %674, %v426_v42  }
 0x1db   : > { %683 = vset.pattern.permute.xlu0 %v435_v47  ;;  %677 = vset.pattern.permute.xlu2 %v447_v57 }
 0x1dc   : > { %678 = vset.pattern.permute.xlu1 %v453_v24 }
 0x1e3   : > { %486 = vperm.xlu0 %683, %v475_v32   ;;  %449 = vperm.xlu2 %677, %v426_v42  }
 0x1e4   : > { %455 = vperm.xlu1 %678, %v426_v42  }
 0x1eb   : > { %688 = vset.pattern.permute.xlu0 %v465_v7  ;;  %679 = vset.pattern.permute.xlu2 %v459_v15 }
 0x1ec   : > { %680 = vset.pattern.permute.xlu1 %v465_v7 }
 0x1f3   : > { %516 = vperm.xlu0 %688, %v475_v32   ;;  %461 = vperm.xlu2 %679, %v426_v42  }
 0x1f4   : > { %467 = vperm.xlu1 %680, %v426_v42  }
 0x1fb   : > { %681 = vset.pattern.permute.xlu2 %v471_v56  ;;  %690 = vset.pattern.permute.xlu0 %v471_v56 }
 0x1fc   : > { %682 = vset.pattern.permute.xlu1 %v428_v16 }
 0x203   : > { %473 = vperm.xlu2 %681, %v426_v42  }
 0x204   : > { %480 = vperm.xlu1 %682, %v475_v32  }
 0x20b   : > { %684 = vset.pattern.permute.xlu2 %v441_v61 }
 0x20c   : > { %685 = vset.pattern.permute.xlu1 %v447_v57 }
 0x213   : > { %492 = vperm.xlu2 %684, %v475_v32  }
 0x214   : > { %498 = vperm.xlu1 %685, %v475_v32  }
 0x21b   : > { %686 = vset.pattern.permute.xlu2 %v453_v24 }
 0x21c   : > { %687 = vset.pattern.permute.xlu1 %v459_v15 }
 0x223   : > { %504 = vperm.xlu2 %686, %v475_v32  }
 0x224   : > { %510 = vperm.xlu1 %687, %v475_v32  }
 0x22b   : > { %689 = vset.pattern.permute.xlu2 %v471_v56 }
 0x22d   : > { %v438_v25 = vpop.permute.xlu2 %437 }
 0x22e   : > { %v526_v26 = vmul.f32 %v438_v25, %v775_v11  ;;  %v527_v60 = vmul.f32 %v438_v25, %v778_v12 }
 0x230   : > { %558 = vst [vmem:[%s914_s13 + $0x10] sm:$0xff] %v526_v26 }
 0x231   : > { %559 = vst [vmem:[%s914_s13 + $0x18] sm:$0xff] %v527_v60 }
 0x233   : > { %522 = vperm.xlu2 %689, %v475_v32  }
 0x23d   : > { %v450_v31 = vpop.permute.xlu2 %449 }
 0x23e   : > { %v530_v46 = vmul.f32 %v450_v31, %v799_v20  ;;  %v531_v50 = vmul.f32 %v450_v31, %v802_v21 }
 0x240   : > { %562 = vst [vmem:[%s914_s13 + $0x30] sm:$0xff] %v530_v46 }
 0x241   : > { %563 = vst [vmem:[%s914_s13 + $0x38] sm:$0xff] %v531_v50 }
 0x245   : > { %v444_v51 = vpop.permute.xlu0 %443 }
 0x246   : > { %v528_v11 = vmul.f32 %v444_v51, %v759_v5  ;;  %v529_v12 = vmul.f32 %v444_v51, %v762_v6  ;;  %v432_v58 = vpop.permute.xlu1 %431 }
 0x247   : > { %v524_v52 = vmul.f32 %v432_v58, %v751_v2  ;;  %v525_v34 = vmul.f32 %v432_v58, %v756_v4 }
 0x248   : > { %560 = vst [vmem:[%s914_s13 + $0x20] sm:$0xff] %v528_v11 }
 0x249   : > { %561 = vst [vmem:[%s914_s13 + $0x28] sm:$0xff] %v529_v12 }
 0x24a   : > { %556 = vst [vmem:[%s914_s13] sm:$0xff] %v524_v52 }
 0x24b   : > { %557 = vst [vmem:[%s914_s13 + $0x8] sm:$0xff] %v525_v34 }
 0x24d   : > { %v462_v20 = vpop.permute.xlu2 %461 }
 0x24e   : > { %v534_v21 = vmul.f32 %v462_v20, %v817_v27  ;;  %v535_v5 = vmul.f32 %v462_v20, %v820_v28 }
 0x250   : > { %566 = vst [vmem:[%s914_s13 + $0x50] sm:$0xff] %v534_v21 }
 0x251   : > { %567 = vst [vmem:[%s914_s13 + $0x58] sm:$0xff] %v535_v5 }
 0x255   : > { %v487_v2 = vpop.permute.xlu0 %486 }
 0x256   : > { %v542_v4 = vmul.f32 %v487_v2, %v769_v9  ;;  %v543_v6 = vmul.f32 %v487_v2, %v772_v10  ;;  %v456_v44 = vpop.permute.xlu1 %455 }
 0x257   : > { %v532_v16 = vmul.f32 %v456_v44, %v805_v22  ;;  %v533_v61 = vmul.f32 %v456_v44, %v808_v23 }
 0x258   : > { %574 = vst [vmem:[%s914_s13 + $0x90] sm:$0xff] %v542_v4 }
 0x259   : > { %575 = vst [vmem:[%s914_s13 + $0x98] sm:$0xff] %v543_v6 }
 0x25a   : > { %564 = vst [vmem:[%s914_s13 + $0x40] sm:$0xff] %v532_v16 }
 0x25b   : > { %565 = vst [vmem:[%s914_s13 + $0x48] sm:$0xff] %v533_v61 }
 0x25d   : > { %v474_v27 = vpop.permute.xlu2 %473 }
 0x25e   : > { %v538_v28 = vmul.f32 %v474_v27, %v853_v40  ;;  %v539_v9 = vmul.f32 %v474_v27, %v856_v41 }
 0x260   : > { %570 = vst [vmem:[%s914_s13 + $0x70] sm:$0xff] %v538_v28 }
 0x261   : > { %571 = vst [vmem:[%s914_s13 + $0x78] sm:$0xff] %v539_v9 }
 0x265   : > { %v517_v10 = vpop.permute.xlu0 %516 }
 0x266   : > { %v468_v22 = vpop.permute.xlu1 %467  ;;  %v552_v23 = vmul.f32 %v517_v10, %v841_v36  ;;  %v553_v8 = vmul.f32 %v517_v10, %v844_v37 }
 0x267   : > { %v536_v47 = vmul.f32 %v468_v22, %v847_v38  ;;  %v537_v43 = vmul.f32 %v468_v22, %v850_v39 }
 0x268   : > { %584 = vst [vmem:[%s914_s13 + $0xe0] sm:$0xff] %v552_v23 }
 0x269   : > { %568 = vst [vmem:[%s914_s13 + $0x60] sm:$0xff] %v536_v47 }
 0x26a   : > { %569 = vst [vmem:[%s914_s13 + $0x68] sm:$0xff] %v537_v43 }
 0x26b   : > { %585 = vst [vmem:[%s914_s13 + $0xe8] sm:$0xff] %v553_v8 }
 0x26d   : > { %v493_v40 = vpop.permute.xlu2 %492 }
 0x26e   : > { %v544_v41 = vmul.f32 %v493_v40, %v781_v13  ;;  %v545_v17 = vmul.f32 %v493_v40, %v784_v14 }
 0x270   : > { %576 = vst [vmem:[%s914_s13 + $0xa0] sm:$0xff] %v544_v41 }
 0x271   : > { %577 = vst [vmem:[%s914_s13 + $0xa8] sm:$0xff] %v545_v17 }
 0x276   : > { %v481_v36 = vpop.permute.xlu1 %480 }
 0x277   : > { %v540_v38 = vmul.f32 %v481_v36, %v745_v0  ;;  %v541_v37 = vmul.f32 %v481_v36, %v748_v1 }
 0x279   : > { %572 = vst [vmem:[%s914_s13 + $0x80] sm:$0xff] %v540_v38 }
 0x27a   : > { %573 = vst [vmem:[%s914_s13 + $0x88] sm:$0xff] %v541_v37 }
 0x27d   : > { %v505_v39 = vpop.permute.xlu2 %504 }
 0x27e   : > { %v548_v35 = vmul.f32 %v505_v39, %v823_v29  ;;  %v549_v13 = vmul.f32 %v505_v39, %v826_v30  ;;  %v996_v30 = vld [vmem:[#allocation2_spill] sm:$0xff] }
 0x280   : > { %580 = vst [vmem:[%s914_s13 + $0xc0] sm:$0xff] %v548_v35 }
 0x281   : > { %581 = vst [vmem:[%s914_s13 + $0xc8] sm:$0xff] %v549_v13 }
 0x286   : > { %v499_v14 = vpop.permute.xlu1 %498 }
 0x287   : > { %v546_v48 = vmul.f32 %v499_v14, %v793_v18  ;;  %v547_v0 = vmul.f32 %v499_v14, %v796_v19 }
 0x289   : > { %578 = vst [vmem:[%s914_s13 + $0xb0] sm:$0xff] %v546_v48 }
 0x28a   : > { %579 = vst [vmem:[%s914_s13 + $0xb8] sm:$0xff] %v547_v0 }
 0x28d   : > { %v523_v1 = vpop.permute.xlu2 %522 }
 0x28e   : > { %v554_v49 = vmul.f32 %v523_v1, %v865_v45  ;;  %v555_v55 = vmul.f32 %v523_v1, %v995_v54 }
 0x290   : > { %586 = vst [vmem:[%s914_s13 + $0xf0] sm:$0xff] %v554_v49 }
 0x291   : > { %587 = vst [vmem:[%s914_s13 + $0xf8] sm:$0xff] %v555_v55 }
 0x296   : > { %v511_v29 = vpop.permute.xlu1 %510 }
 0x297   : > { %v550_v33 = vmul.f32 %v511_v29, %v996_v30  ;;  %v551_v53 = vmul.f32 %v511_v29, %v997_v59 }
 0x299   : > { %582 = vst [vmem:[%s914_s13 + $0xd0] sm:$0xff] %v550_v33 }
 0x29a   : > { %583 = vst [vmem:[%s914_s13 + $0xd8] sm:$0xff] %v551_v53 }
 0x29b PF: > { %s13_s12 = sadd.s32 1, %s703_s12  }
 0x29c   : > { %p10_p4 = scmp.ge.s32.totalorder %s13_s12, 4  }
 0x29e   :  { %12 = sbr.rel (!%p10_p4) target bundleno = 1 (0x1), region = 62 }

</bundles_post_ra>
